<compile_context>
chip_gen: v5e
topology: v5e:2x2
jax: 0.10.0
libtpu: 0.0.40
codegen_flags: <defaults>
</compile_context>

<pallas_src>
import jax
import jax.numpy as jnp
from jax.experimental import pallas as pl
from jax.experimental.pallas import tpu as pltpu


def _prelu(x, a):
    # PyTorch nn.PReLU() default: single learnable scalar, init 0.25
    return jnp.maximum(x, 0.0) + a * jnp.minimum(x, 0.0)


def classification_net_kernel(
    x_ref,      # (TB, D)  VMEM  input tile
    w1_ref,     # (D, H)   VMEM  embedding fc1
    b1_ref,     # (1, H)   VMEM
    w2_ref,     # (H, 2)   VMEM  embedding fc2 -> 2-dim embedding
    b2_ref,     # (1, 2)   VMEM
    wfc_ref,    # (2, C)   VMEM  ClassificationNet.fc1
    bfc_ref,    # (1, C)   VMEM
    a1_ref,     # (1, 1)   SMEM  embedding PReLU scalar
    acls_ref,   # (1, 1)   SMEM  ClassificationNet.nonlinear scalar
    out_ref,    # (TB, C)  VMEM  log-softmax scores
):
    x = x_ref[...].astype(jnp.float32)

    # ---- embedding_net: Linear(D, H) -> PReLU -> Linear(H, 2) ----
    h = jnp.dot(x, w1_ref[...], preferred_element_type=jnp.float32) + b1_ref[...]
    h = _prelu(h, a1_ref[0, 0])
    # Output is only 2 lanes wide, but the contraction over H still uses the MXU
    # usefully; keep it as a dot.
    emb = jnp.dot(h, w2_ref[...], preferred_element_type=jnp.float32) + b2_ref[...]

    # ---- ClassificationNet head: PReLU -> Linear(2, C) as two VPU FMAs ----
    emb = _prelu(emb, acls_ref[0, 0])
    logits = (emb[:, 0:1] * wfc_ref[0:1, :]
              + emb[:, 1:2] * wfc_ref[1:2, :]
              + bfc_ref[...])

    # stable log_softmax along last dim (f32 epilogue)
    m = jnp.max(logits, axis=-1, keepdims=True)
    shifted = logits - m
    lse = jnp.log(jnp.sum(jnp.exp(shifted), axis=-1, keepdims=True))
    out_ref[...] = (shifted - lse).astype(out_ref.dtype)


def classification_net(x, params, *, tile_b=512):
    """Fused forward pass. x: (B, D) float32."""
    B, D = x.shape
    H = params["w1"].shape[1]
    C = params["wfc"].shape[1]

    # TILE_B sizing: 512 is a safe default for v7x's 64 MiB VMEM (2x double-
    # buffered x + out tiles stay well under the scoped limit); on v6e/v5e
    # (128 MiB VMEM) callers can pass tile_b=1024-2048 to amortize per-step
    # overhead further.
    tile_b = min(tile_b, B)
    if tile_b != B and tile_b % 8 != 0:
        tile_b = max(8, (tile_b // 8) * 8)   # sublane-aligned partial tiling
    grid = (pl.cdiv(B, tile_b),)

    def resident(shape):
        # weights/biases: same full block at every grid step -> stay in VMEM
        return pl.BlockSpec(shape, lambda i: (0, 0), memory_space=pltpu.VMEM)

    smem_scalar = pl.BlockSpec((1, 1), lambda i: (0, 0),
                               memory_space=pltpu.SMEM)

    return pl.pallas_call(
        classification_net_kernel,
        out_shape=jax.ShapeDtypeStruct((B, C), jnp.float32),
        grid=grid,
        in_specs=[
            pl.BlockSpec((tile_b, D), lambda i: (i, 0)),   # x: batch-tiled
            resident((D, H)),                              # w1
            resident((1, H)),                              # b1
            resident((H, 2)),                              # w2
            resident((1, 2)),                              # b2
            resident((2, C)),                              # wfc
            resident((1, C)),                              # bfc
            smem_scalar,                                   # a1  (PReLU scalar)
            smem_scalar,                                   # a_cls
        ],
        out_specs=pl.BlockSpec((tile_b, C), lambda i: (i, 0)),
        compiler_params=pltpu.CompilerParams(
            dimension_semantics=("parallel",)),
    )(
        x,
        params["w1"], params["b1"],
        params["w2"], params["b2"],
        params["wfc"], params["bfc"],
        params["a1"], params["a_cls"],
    )


def init_params(key, d_in, hidden, n_classes):
    # Deterministic init mimicking PyTorch Linear default (uniform +-1/sqrt(fan_in)).
    ks = jax.random.split(key, 6)

    def lin(kw, kb, fan_in, fan_out):
        bound = 1.0 / jnp.sqrt(fan_in)
        w = jax.random.uniform(kw, (fan_in, fan_out), jnp.float32, -bound, bound)
        b = jax.random.uniform(kb, (1, fan_out), jnp.float32, -bound, bound)
        return w, b

    w1, b1 = lin(ks[0], ks[1], d_in, hidden)
    w2, b2 = lin(ks[2], ks[3], hidden, 2)
    wfc, bfc = lin(ks[4], ks[5], 2, n_classes)
    return {
        "w1": w1, "b1": b1, "a1": jnp.full((1, 1), 0.25, jnp.float32),
        "w2": w2, "b2": b2,
        "a_cls": jnp.full((1, 1), 0.25, jnp.float32),
        "wfc": wfc, "bfc": bfc,
    }


def reference(x, p):
    h = x @ p["w1"] + p["b1"]
    h = jnp.maximum(h, 0) + p["a1"][0, 0] * jnp.minimum(h, 0)
    e = h @ p["w2"] + p["b2"]
    e = jnp.maximum(e, 0) + p["a_cls"][0, 0] * jnp.minimum(e, 0)
    logits = e @ p["wfc"] + p["bfc"]
    return jax.nn.log_softmax(logits, axis=-1)


if __name__ == "__main__":
    B, D, H, C = 8, 32, 32, 10
    key = jax.random.PRNGKey(0)
    kx, kp = jax.random.split(key)
    x = jax.random.normal(kx, (B, D), jnp.float32)
    params = init_params(kp, D, H, C)

    scores = classification_net(x, params)
    jax.block_until_ready(scores)

    ref = reference(x, params)
    assert scores.shape == (B, C)
    assert jnp.allclose(scores, ref, atol=1e-5, rtol=1e-5)
    print("KERNEL_OK")
</pallas_src>

<mosaic_0001>
module attributes {stable_mosaic.version = 11 : i64} {
  func.func @classification_net_kernel(%arg0: i32, %arg1: memref<8x32xf32, #tpu.memory_space<vmem>>, %arg2: memref<32x32xf32, #tpu.memory_space<vmem>>, %arg3: memref<1x32xf32, #tpu.memory_space<vmem>>, %arg4: memref<32x2xf32, #tpu.memory_space<vmem>>, %arg5: memref<1x2xf32, #tpu.memory_space<vmem>>, %arg6: memref<2x10xf32, #tpu.memory_space<vmem>>, %arg7: memref<1x10xf32, #tpu.memory_space<vmem>>, %arg8: memref<1x1xf32, #tpu.memory_space<smem>>, %arg9: memref<1x1xf32, #tpu.memory_space<smem>>, %arg10: memref<8x10xf32, #tpu.memory_space<vmem>>) attributes {dimension_semantics = [#tpu.dimension_semantics<parallel>], iteration_bounds = array<i64: 1>, scalar_prefetch = 0 : i64, scratch_operands = 0 : i64, tpu.core_type = #tpu.core_type<tc>, window_params = [{transform_indices = @transform_0, window_bounds = array<i64: 8, 32>}, {pipeline_mode = #tpu.pipeline_mode<synchronous>, transform_indices = @transform_1, window_bounds = array<i64: 32, 32>}, {pipeline_mode = #tpu.pipeline_mode<synchronous>, transform_indices = @transform_2, window_bounds = array<i64: 1, 32>}, {pipeline_mode = #tpu.pipeline_mode<synchronous>, transform_indices = @transform_3, window_bounds = array<i64: 32, 2>}, {pipeline_mode = #tpu.pipeline_mode<synchronous>, transform_indices = @transform_4, window_bounds = array<i64: 1, 2>}, {pipeline_mode = #tpu.pipeline_mode<synchronous>, transform_indices = @transform_5, window_bounds = array<i64: 2, 10>}, {pipeline_mode = #tpu.pipeline_mode<synchronous>, transform_indices = @transform_6, window_bounds = array<i64: 1, 10>}, {transform_indices = @transform_7, window_bounds = array<i64: 1, 1>}, {transform_indices = @transform_8, window_bounds = array<i64: 1, 1>}, {transform_indices = @transform_9, window_bounds = array<i64: 8, 10>}]} {
    %c0 = arith.constant 0 : index
    %c0_0 = arith.constant 0 : index
    %0 = vector.load %arg1[%c0, %c0_0] : memref<8x32xf32, #tpu.memory_space<vmem>>, vector<8x32xf32>
    %c0_1 = arith.constant 0 : index
    %c0_2 = arith.constant 0 : index
    %1 = vector.load %arg2[%c0_1, %c0_2] : memref<32x32xf32, #tpu.memory_space<vmem>>, vector<32x32xf32>
    %cst = arith.constant dense<0.000000e+00> : vector<8x32xf32>
    %2 = tpu.matmul %0, %1, %cst {dimension_numbers = #tpu.dot_dimension_numbers<[1], [0], [0], [1], [0, 0, 1, 1], [], []>} : vector<8x32xf32>, vector<32x32xf32>, vector<8x32xf32> -> vector<8x32xf32>
    %c0_3 = arith.constant 0 : index
    %c0_4 = arith.constant 0 : index
    %3 = vector.load %arg3[%c0_3, %c0_4] : memref<1x32xf32, #tpu.memory_space<vmem>>, vector<1x32xf32>
    %4 = vector.broadcast %3 : vector<1x32xf32> to vector<8x32xf32>
    %5 = arith.addf %2, %4 : vector<8x32xf32>
    %c0_5 = arith.constant 0 : index
    %c0_6 = arith.constant 0 : index
    %6 = memref.load %arg8[%c0_5, %c0_6] : memref<1x1xf32, #tpu.memory_space<smem>>
    %cst_7 = arith.constant 0.000000e+00 : f32
    %7 = vector.broadcast %cst_7 : f32 to vector<8x32xf32>
    %8 = arith.maximumf %5, %7 : vector<8x32xf32>
    %cst_8 = arith.constant 0.000000e+00 : f32
    %9 = vector.broadcast %cst_8 : f32 to vector<8x32xf32>
    %10 = arith.minimumf %5, %9 : vector<8x32xf32>
    %11 = vector.broadcast %6 : f32 to vector<8x32xf32>
    %12 = arith.mulf %11, %10 : vector<8x32xf32>
    %13 = arith.addf %8, %12 : vector<8x32xf32>
    %c0_9 = arith.constant 0 : index
    %c0_10 = arith.constant 0 : index
    %14 = vector.load %arg4[%c0_9, %c0_10] : memref<32x2xf32, #tpu.memory_space<vmem>>, vector<32x2xf32>
    %cst_11 = arith.constant dense<0.000000e+00> : vector<8x2xf32>
    %15 = tpu.matmul %13, %14, %cst_11 {dimension_numbers = #tpu.dot_dimension_numbers<[1], [0], [0], [1], [0, 0, 1, 1], [], []>} : vector<8x32xf32>, vector<32x2xf32>, vector<8x2xf32> -> vector<8x2xf32>
    %c0_12 = arith.constant 0 : index
    %c0_13 = arith.constant 0 : index
    %16 = vector.load %arg5[%c0_12, %c0_13] : memref<1x2xf32, #tpu.memory_space<vmem>>, vector<1x2xf32>
    %17 = vector.broadcast %16 : vector<1x2xf32> to vector<8x2xf32>
    %18 = arith.addf %15, %17 : vector<8x2xf32>
    %c0_14 = arith.constant 0 : index
    %c0_15 = arith.constant 0 : index
    %19 = memref.load %arg9[%c0_14, %c0_15] : memref<1x1xf32, #tpu.memory_space<smem>>
    %cst_16 = arith.constant 0.000000e+00 : f32
    %20 = vector.broadcast %cst_16 : f32 to vector<8x2xf32>
    %21 = arith.maximumf %18, %20 : vector<8x2xf32>
    %cst_17 = arith.constant 0.000000e+00 : f32
    %22 = vector.broadcast %cst_17 : f32 to vector<8x2xf32>
    %23 = arith.minimumf %18, %22 : vector<8x2xf32>
    %24 = vector.broadcast %19 : f32 to vector<8x2xf32>
    %25 = arith.mulf %24, %23 : vector<8x2xf32>
    %26 = arith.addf %21, %25 : vector<8x2xf32>
    %27 = vector.extract_strided_slice %26 {offsets = [0, 0], sizes = [8, 1], strides = [1, 1]} : vector<8x2xf32> to vector<8x1xf32>
    %c0_18 = arith.constant 0 : index
    %c0_19 = arith.constant 0 : index
    %28 = vector.load %arg6[%c0_18, %c0_19] : memref<2x10xf32, #tpu.memory_space<vmem>>, vector<1x10xf32>
    %29 = vector.broadcast %27 : vector<8x1xf32> to vector<8x10xf32>
    %30 = vector.broadcast %28 : vector<1x10xf32> to vector<8x10xf32>
    %31 = arith.mulf %29, %30 : vector<8x10xf32>
    %32 = vector.extract_strided_slice %26 {offsets = [0, 1], sizes = [8, 1], strides = [1, 1]} : vector<8x2xf32> to vector<8x1xf32>
    %c1 = arith.constant 1 : index
    %c0_20 = arith.constant 0 : index
    %33 = vector.load %arg6[%c1, %c0_20] : memref<2x10xf32, #tpu.memory_space<vmem>>, vector<1x10xf32>
    %34 = vector.broadcast %32 : vector<8x1xf32> to vector<8x10xf32>
    %35 = vector.broadcast %33 : vector<1x10xf32> to vector<8x10xf32>
    %36 = arith.mulf %34, %35 : vector<8x10xf32>
    %37 = arith.addf %31, %36 : vector<8x10xf32>
    %c0_21 = arith.constant 0 : index
    %c0_22 = arith.constant 0 : index
    %38 = vector.load %arg7[%c0_21, %c0_22] : memref<1x10xf32, #tpu.memory_space<vmem>>, vector<1x10xf32>
    %39 = vector.broadcast %38 : vector<1x10xf32> to vector<8x10xf32>
    %40 = arith.addf %37, %39 : vector<8x10xf32>
    %cst_23 = arith.constant dense<0xFF800000> : vector<8xf32>
    %41 = vector.multi_reduction <maximumf>, %40, %cst_23 [1] : vector<8x10xf32> to vector<8xf32>
    %42 = vector.shape_cast %41 : vector<8xf32> to vector<8x1xf32>
    %43 = vector.broadcast %42 : vector<8x1xf32> to vector<8x10xf32>
    %44 = arith.subf %40, %43 : vector<8x10xf32>
    %45 = math.exp %44 : vector<8x10xf32>
    %cst_24 = arith.constant dense<0.000000e+00> : vector<8xf32>
    %46 = vector.multi_reduction <add>, %45, %cst_24 [1] : vector<8x10xf32> to vector<8xf32>
    %47 = vector.shape_cast %46 : vector<8xf32> to vector<8x1xf32>
    %48 = math.log %47 : vector<8x1xf32>
    %49 = vector.broadcast %48 : vector<8x1xf32> to vector<8x10xf32>
    %50 = arith.subf %44, %49 : vector<8x10xf32>
    %c0_25 = arith.constant 0 : index
    %c0_26 = arith.constant 0 : index
    %51 = vector.load %arg10[%c0_25, %c0_26] : memref<8x10xf32, #tpu.memory_space<vmem>>, vector<8x10xf32>
    tpu.vector_store %arg10[%c0_25, %c0_26], %50 {strides = array<i32>} : memref<8x10xf32, #tpu.memory_space<vmem>>, vector<8x10xf32>,
    return
  }
  func.func @transform_0(%arg0: i32) -> (i32, i32) {
    %c0_i32 = arith.constant 0 : i32
    %c0_i32_0 = arith.constant 0 : i32
    return %arg0, %c0_i32 : i32, i32
  }
  func.func @transform_1(%arg0: i32) -> (i32, i32) {
    %c0_i32 = arith.constant 0 : i32
    %c0_i32_0 = arith.constant 0 : i32
    %c0_i32_1 = arith.constant 0 : i32
    return %c0_i32, %c0_i32_0 : i32, i32
  }
  func.func @transform_2(%arg0: i32) -> (i32, i32) {
    %c0_i32 = arith.constant 0 : i32
    %c0_i32_0 = arith.constant 0 : i32
    %c0_i32_1 = arith.constant 0 : i32
    return %c0_i32, %c0_i32_0 : i32, i32
  }
  func.func @transform_3(%arg0: i32) -> (i32, i32) {
    %c0_i32 = arith.constant 0 : i32
    %c0_i32_0 = arith.constant 0 : i32
    %c0_i32_1 = arith.constant 0 : i32
    return %c0_i32, %c0_i32_0 : i32, i32
  }
  func.func @transform_4(%arg0: i32) -> (i32, i32) {
    %c0_i32 = arith.constant 0 : i32
    %c0_i32_0 = arith.constant 0 : i32
    %c0_i32_1 = arith.constant 0 : i32
    return %c0_i32, %c0_i32_0 : i32, i32
  }
  func.func @transform_5(%arg0: i32) -> (i32, i32) {
    %c0_i32 = arith.constant 0 : i32
    %c0_i32_0 = arith.constant 0 : i32
    %c0_i32_1 = arith.constant 0 : i32
    return %c0_i32, %c0_i32_0 : i32, i32
  }
  func.func @transform_6(%arg0: i32) -> (i32, i32) {
    %c0_i32 = arith.constant 0 : i32
    %c0_i32_0 = arith.constant 0 : i32
    %c0_i32_1 = arith.constant 0 : i32
    return %c0_i32, %c0_i32_0 : i32, i32
  }
  func.func @transform_7(%arg0: i32) -> (i32, i32) {
    %c0_i32 = arith.constant 0 : i32
    %c0_i32_0 = arith.constant 0 : i32
    %c0_i32_1 = arith.constant 0 : i32
    return %c0_i32, %c0_i32_0 : i32, i32
  }
  func.func @transform_8(%arg0: i32) -> (i32, i32) {
    %c0_i32 = arith.constant 0 : i32
    %c0_i32_0 = arith.constant 0 : i32
    %c0_i32_1 = arith.constant 0 : i32
    return %c0_i32, %c0_i32_0 : i32, i32
  }
  func.func @transform_9(%arg0: i32) -> (i32, i32) {
    %c0_i32 = arith.constant 0 : i32
    %c0_i32_0 = arith.constant 0 : i32
    return %arg0, %c0_i32 : i32, i32
  }
}

</mosaic_0001>

<bundles_post_ra>
// kernel: tpu_custom_call.1
= control target key start
LH: loop header
LB: loop body
LE: loop exit
PB: predicated region body
PF: predicated region fallthrough
CT: control target
= control target key end

     0   :  { %16 = vsyncpa [#allocation5], 0  ;;  %s356_s0 = inlined_call_operand.hbm [shape: f32[8,32], index: 0, kind: input, shape index: {}]   ;;  %s357_s1 = inlined_call_operand.vmem [shape: f32[32,32], index: 1, kind: input, shape index: {}]   ;;  %s358_s2 = inlined_call_operand.vmem [shape: f32[1,32], index: 2, kind: input, shape index: {}]   ;;  %s359_s3 = inlined_call_operand.vmem [shape: f32[32,2], index: 3, kind: input, shape index: {}]   ;;  %s360_s4 = inlined_call_operand.vmem [shape: f32[1,2], index: 4, kind: input, shape index: {}]   ;;  %s361_s5 = inlined_call_operand.vmem [shape: f32[2,10], index: 5, kind: input, shape index: {}]   ;;  %s362_s6 = inlined_call_operand.vmem [shape: f32[1,10], index: 6, kind: input, shape index: {}]   ;;  %s363_s7 = inlined_call_operand.<no memory space> [shape: f32[1,1], index: 7, kind: input, shape index: {}]   ;;  %s364_s8 = inlined_call_operand.<no memory space> [shape: f32[1,1], index: 8, kind: input, shape index: {}]   ;;  %s365_s9 = inlined_call_operand.hbm [shape: f32[8,10], index: 9, kind: output, shape index: {}]  }
   0x1   :  { %17 = vsyncpa [#allocation6], 0  ;;  %s23_s11 = sshll.u32 %s356_s0, 4  ;;  %s246_s12 = smov [#allocation4]   ;;  %s24_s11 = int_to_ptr.hbm [resolvable:$true] %s23_s11 }
   0x2   :  { %s25_s13 = sshll.u32 %s246_s12, 4  ;;  %s26_s13 = int_to_ptr.vmem [resolvable:$true] %s25_s13 }
   0x3   :  { %28 = dma.hbm_to_vmem [thread:$0]  %s24_s11, 128, %s26_s13, [#allocation5]  }
   0x4   :  { %242 = dma.done.wait [#allocation5], 128  }
   0x5   :  { %243 = vsyncadd [#allocation5], 4294967168  ;;  %v53_v0 = vld [vmem:[%s357_s1 + $0x18] sm:$0xff]  ;;  %v52_v1 = vld [vmem:[%s357_s1 + $0x10] sm:$0xff]  ;;  %vm58_vm0 = vcmask 261120   ;;  %v85_v12 = vstv %s363_s7  ;;  %v247_v17 = vmov 0   ;;  %v122_v21 = vstv %s364_s8 }
   0x6   :  { %74 = vmatpush.msra.mxu0 %v53_v0  ;;  %v51_v2 = vld [vmem:[%s357_s1 + $0x8] sm:$0xff]  ;;  %v50_v3 = vld [vmem:[%s357_s1] sm:$0xff]  ;;  %v91_v5 = vld [vmem:[%s359_s3 + $0x18] sm:$0xff]  ;;  %183 = vset.pattern.permute.xlu0 %v247_v17  ;;  %v248_v26 = vmov 1   ;;  %vm146_vm1 = vcmask 80896   ;;  %s167_s18 = sshll.u32 %s365_s9, 4  ;;  %s168_s18 = int_to_ptr.hbm [resolvable:$true] %s167_s18 }
   0x7   :  { %v49_v4 = vld [vmem:[#allocation4] sm:$0xff]  ;;  %111 = vmatpush.msra.mxu1 %v91_v5  ;;  %v90_v6 = vld [vmem:[%s359_s3 + $0x10] sm:$0xff]  ;;  %v89_v7 = vld [vmem:[%s359_s3 + $0x8] sm:$0xff] }
   0x8   :  { %75 = vmatpush.msra.mxu0 %v52_v1  ;;  %v88_v8 = vld [vmem:[%s359_s3] sm:$0xff] }
   0x9   :  { %112 = vmatpush.msra.mxu1 %v90_v6  ;;  %v185_v9 = vld [vmem:[%s358_s2] ss:$0 sm:$0xff]  ;;  %v188_v29 = vld [vmem:[%s361_s5 + $0x1] ss:$0 sm:$0xff] }
   0xa   :  { %76 = vmatpush.msra.mxu0 %v51_v2  ;;  %v186_v18 = vld [vmem:[%s360_s4] ss:$0 sm:$0xff] }
   0xb   :  { %113 = vmatpush.msra.mxu1 %v89_v7  ;;  %v187_v28 = vld [vmem:[%s361_s5] ss:$0 sm:$0xff]  ;;  %s249_s5 = smov [#allocation7]  }
   0xc   :  { %77 = vmatpush.msra.mxu0 %v50_v3  ;;  %v189_v33 = vld [vmem:[%s362_s6] ss:$0 sm:$0xff]  ;;  %s165_s16 = sshll.u32 %s249_s5, 4  ;;  %s166_s16 = int_to_ptr.vmem [resolvable:$true] %s165_s16 }
   0xd   :  { %177 = vmatmul.msk.f32.vlgmr.msra.gmra.mxu0 %vm58_vm0, %v49_v4  ;;  %114 = vmatpush.msra.mxu1 %v88_v8 }
  0x8a   :  { %v79_v10 = vpop.f32.mrf.mxu0 }
  0x8b   :  { %v80_v11 = vadd.f32 %v185_v9, %v79_v10 }
  0x8d   :  { %v84_v13 = vmin.f32 %v80_v11, 0.0  ;;  %v83_v14 = vmax.f32 %v80_v11, 0.0 }
  0x8f   :  { %v86_v15 = vmul.f32 %v85_v12, %v84_v13 }
  0x91   :  { %v87_v16 = vadd.f32 %v86_v15, %v83_v14 }
  0x93   :  { %178 = vmatmul.msk.f32.vlgmr.msra.gmra.mxu1 %vm58_vm0, %v87_v16 }
 0x110   :  { %v116_v19 = vpop.f32.mrf.mxu1 }
 0x111   :  { %v117_v20 = vadd.f32 %v186_v18, %v116_v19 }
 0x113   :  { %v121_v22 = vmin.f32 %v117_v20, 0.0  ;;  %v120_v23 = vmax.f32 %v117_v20, 0.0 }
 0x115   :  { %v123_v24 = vmul.f32 %v122_v21, %v121_v22 }
 0x117   :  { %v124_v25 = vadd.f32 %v123_v24, %v120_v23 }
 0x119   :  { %128 = vperm.xlu0 %183, %v124_v25  }
 0x121   :  { %184 = vset.pattern.permute.xlu0 %v248_v26 }
 0x122   :  { %135 = vperm.xlu0 %184, %v124_v25  }
 0x18b   :  { %v129_v27 = vpop.permute.xlu0 %128 }
 0x18c   :  { %v132_v31 = vmul.f32 %v187_v28, %v129_v27 }
 0x194   :  { %v136_v30 = vpop.permute.xlu0 %135 }
 0x195   :  { %v139_v32 = vmul.f32 %v188_v29, %v136_v30 }
 0x197   :  { %v140_v34 = vadd.f32 %v139_v32, %v132_v31 }
 0x199   :  { %v145_v35 = vadd.f32 %v189_v33, %v140_v34 }
 0x19b   :  { %v147_v36 = vsel %vm146_vm1, %v145_v35, -inf }
 0x19c   :  { %148 = vmax.xlane.f32.xlu1 %v147_v36 }
 0x20f   :  { %v149_v37 = vpop.xlane.xlu1 %148 }
 0x210   :  { %v150_v38 = vsub.f32 %v145_v35, %v149_v37 }
 0x212   :  { %v151_v39 = vmul.f32 1.442695, %v150_v38 }
 0x214   :  { %190 = vpow2.f32 %v151_v39 }
 0x21a   :  { %v191_v40 = vpop.eup %190 }
 0x21b   :  { %v153_v41 = vsel %vm146_vm1, %v191_v40, 0.0 }
 0x21c   :  { %154 = vadd.xlane.f32.xlu1 %v153_v41 }
 0x28f   :  { %v155_v42 = vpop.xlane.xlu1 %154 }
 0x290   :  { %192 = vlog2.f32 %v155_v42 }
 0x296   :  { %v193_v43 = vpop.eup %192 }
 0x297   :  { %v157_v44 = vmul.f32 0.6931472, %v193_v43 }
 0x299   :  { %v158_v45 = vsub.f32 %v150_v38, %v157_v44 }
 0x29b   :  { %159 = vst.msk [vmem:[#allocation7] sm:$0xff] %vm146_vm1, %v158_v45 }
 0x29c   :  { %170 = dma.vmem_to_hbm [thread:$0]  %s166_s16, 128, %s168_s18, [#allocation6]  }
 0x29d   :  { %244 = dma.done.wait [#allocation6], 128  }
 0x29e   :  { %245 = vsyncadd [#allocation6], 4294967168 }
 0x29f   :  { %175 = vsyncpa [#allocation5], 1 }
 0x2a0   :  { %176 = vsyncpa [#allocation6], 1 }

</bundles_post_ra>
